<compile_context>
chip_gen: v6e
topology: v6e:2x2x1
jax: 0.10.0
libtpu: 0.0.40
codegen_flags: <defaults>
</compile_context>

<pallas_src>
import functools

import jax
import jax.numpy as jnp
from jax import lax
from jax.experimental import pallas as pl
from jax.experimental.pallas import tpu as pltpu


_MAX_BATCH_TILE = 128               # multiple of 8 (sublane); B<=256 still splits in 2
_TARGET_BLOCK_ELEMS = 512 * 1024    # ~2 MiB f32 per input block
_MAX_TIME_TILE = 8192               # multiple of 128 (lane)


def _round_up(x, m):
    return (x + m - 1) // m * m


def _mape_partial_kernel(forecast_ref, target_ref, mask_ref, out_ref, acc_ref,
                         *, batch, time):
    i = pl.program_id(0)          # batch-tile index  ("parallel")
    j = pl.program_id(1)          # time-tile index   ("arbitrary" reduction)
    nt = pl.num_programs(1)
    tb, tt = acc_ref.shape        # static tile shape

    @pl.when(j == 0)
    def _zero():
        acc_ref[...] = jnp.zeros_like(acc_ref)

    f = forecast_ref[...]
    t = target_ref[...]
    m = mask_ref[...]
    # Upcast only if the caller feeds narrow dtypes (no redundant astype on f32).
    if f.dtype != jnp.float32:
        f = f.astype(jnp.float32)
    if t.dtype != jnp.float32:
        t = t.astype(jnp.float32)
    if m.dtype != jnp.float32:
        m = m.astype(jnp.float32)

    # divide_no_nan: mask/target with NaN and +Inf replaced by 0
    # (-Inf intentionally passes through, matching the PyTorch reference).
    w = m / t
    w = jnp.where(jnp.isnan(w), jnp.float32(0.0), w)
    w = jnp.where(w == jnp.inf, jnp.float32(0.0), w)
    vals = jnp.abs((f - t) * w)

    # Element-wise running sum. Column-padding only exists on the last time
    # tile, so only that step pays the masked add; interior steps stay at the
    # HBM roofline. Padded-row garbage stays in padded acc rows and is masked
    # once in the epilogue.
    time_ragged = (time % tt) != 0
    if time_ragged:
        @pl.when(j < nt - 1)
        def _interior_add():
            acc_ref[...] += vals

        @pl.when(j == nt - 1)
        def _edge_add():
            cols = j * tt + lax.broadcasted_iota(jnp.int32, (1, tt), 1)
            acc_ref[...] += jnp.where(cols < time, vals, jnp.float32(0.0))
    else:
        acc_ref[...] += vals

    # Epilogue: once per batch tile.
    @pl.when(j == nt - 1)
    def _emit():
        acc = acc_ref[...]
        if (batch % tb) != 0:
            rows = i * tb + lax.broadcasted_iota(jnp.int32, (tb, 1), 0)
            acc = jnp.where(rows < batch, acc, jnp.float32(0.0))

        if (tb % 8 == 0) and (tt % 128 == 0):
            # Tree-fold down to one (8,128) vreg with aligned vreg adds
            # (slices are on (8,128) tile boundaries -> no relayout).
            part = acc
            if tb > 8:
                part = acc[0:8, :]
                for r in range(8, tb, 8):
                    part = part + acc[r:r + 8, :]
            blk = part
            if tt > 128:
                blk = part[:, 0:128]
                for c in range(128, tt, 128):
                    blk = blk + part[:, c:c + 128]
            out_ref[...] = blk
        else:
            # Degenerate tiny tiles (B < 8 or T not lane-aligned): scalar reduce,
            # place the total at [0,0] and zeros elsewhere so the host-side
            # dense sum of the slab stays correct.
            total = jnp.sum(acc)
            r_ii = lax.broadcasted_iota(jnp.int32, out_ref.shape, 0)
            c_ii = lax.broadcasted_iota(jnp.int32, out_ref.shape, 1)
            out_ref[...] = jnp.where((r_ii == 0) & (c_ii == 0), total,
                                     jnp.float32(0.0))


def mape_loss(insample, freq, forecast, target, mask):
    """MAPE loss. `insample` and `freq` are unused (as in the reference)."""
    del insample, freq
    B, T = forecast.shape

    # Batch tile: full dim if tiny, otherwise a multiple of 8 chosen to give
    # >= 2 batch tiles (megacore on v7x), capped at 128.
    if B <= 8:
        tb = B
    else:
        tb = min(_MAX_BATCH_TILE, _round_up((B + 1) // 2, 8))

    # Time tile: full dim (always legal) or a lane-aligned tile sized so each
    # input block is ~2 MiB f32.
    tt_pref = min(_MAX_TIME_TILE,
                  max(128, (_TARGET_BLOCK_ELEMS // tb) // 128 * 128))
    tt = T if T <= tt_pref else tt_pref

    nb = pl.cdiv(B, tb)
    nt = pl.cdiv(T, tt)

    kernel = functools.partial(_mape_partial_kernel, batch=B, time=T)
    in_spec = pl.BlockSpec((tb, tt), lambda i, j: (i, j))

    bytes_in = B * T * (forecast.dtype.itemsize + target.dtype.itemsize
                        + mask.dtype.itemsize)

    partials = pl.pallas_call(
        kernel,
        out_shape=jax.ShapeDtypeStruct((nb * 8, 128), jnp.float32),
        grid_spec=pltpu.PrefetchScalarGridSpec(
            num_scalar_prefetch=0,
            grid=(nb, nt),
            in_specs=[in_spec, in_spec, in_spec],
            out_specs=pl.BlockSpec((8, 128), lambda i, j: (i, 0)),
            scratch_shapes=[pltpu.VMEM((tb, tt), jnp.float32)],
        ),
        compiler_params=pltpu.CompilerParams(
            dimension_semantics=("parallel", "arbitrary"),
            vmem_limit_bytes=32 * 1024 * 1024,  # portable across v5e/v6e/v7x
        ),
        cost_estimate=pl.CostEstimate(
            flops=8 * B * T,
            transcendentals=0,
            bytes_accessed=bytes_in + nb * 8 * 128 * 4,
        ),
    )(forecast, target, mask)

    # Dense sum of all per-batch-tile partial slabs, divide by the true count.
    return jnp.sum(partials) / (B * T)


def _reference(forecast, target, mask):
    w = mask / target
    w = jnp.where(jnp.isnan(w), 0.0, w)
    w = jnp.where(w == jnp.inf, 0.0, w)
    return jnp.mean(jnp.abs((forecast - target) * w))


if __name__ == "__main__":
    key = jax.random.PRNGKey(0)
    k1, k2, k3, k4 = jax.random.split(key, 4)

    # --- small shape consistent with the module: (batch=4, time=64) ---
    B, T = 4, 64
    forecast = jax.random.normal(k1, (B, T), dtype=jnp.float32)
    target = jax.random.normal(k2, (B, T), dtype=jnp.float32)
    # Exact zeros in target exercise the divide_no_nan path.
    zero_mask = jax.random.bernoulli(k4, 0.1, (B, T))
    target = jnp.where(zero_mask, 0.0, target)
    mask = jax.random.bernoulli(k3, 0.8, (B, T)).astype(jnp.float32)
    insample = jax.random.normal(k1, (B, 2 * T), dtype=jnp.float32)
    freq = 1

    loss = mape_loss(insample, freq, forecast, target, mask)
    loss = jax.block_until_ready(loss)
    ref = _reference(forecast, target, mask)
    assert jnp.allclose(loss, ref, rtol=1e-5, atol=1e-6), (loss, ref)

    # --- second check: multi-tile grid, accumulator, ragged batch & time edges,
    #     and the vreg-fold epilogue (tb=128, tt=4096 -> grid (3, 2)) ---
    B2, T2 = 260, 4500
    k5, k6, k7, k8 = jax.random.split(jax.random.PRNGKey(1), 4)
    forecast2 = jax.random.normal(k5, (B2, T2), dtype=jnp.float32)
    target2 = jax.random.normal(k6, (B2, T2), dtype=jnp.float32)
    target2 = jnp.where(jax.random.bernoulli(k8, 0.1, (B2, T2)), 0.0, target2)
    mask2 = jax.random.bernoulli(k7, 0.8, (B2, T2)).astype(jnp.float32)

    loss2 = mape_loss(jnp.zeros((B2, 2), jnp.float32), 1, forecast2, target2, mask2)
    loss2 = jax.block_until_ready(loss2)
    ref2 = _reference(forecast2, target2, mask2)
    assert jnp.allclose(loss2, ref2, rtol=1e-4, atol=1e-5), (loss2, ref2)

    print("KERNEL_OK")
</pallas_src>

<mosaic_0001>
module attributes {stable_mosaic.version = 11 : i64} {
  func.func @_mape_partial_kernel(%arg0: i32, %arg1: i32, %arg2: memref<4x64xf32, #tpu.memory_space<vmem>>, %arg3: memref<4x64xf32, #tpu.memory_space<vmem>>, %arg4: memref<4x64xf32, #tpu.memory_space<vmem>>, %arg5: memref<8x128xf32, #tpu.memory_space<vmem>>, %arg6: memref<4x64xf32, #tpu.memory_space<vmem>>) attributes {dimension_semantics = [#tpu.dimension_semantics<parallel>, #tpu.dimension_semantics<arbitrary>], iteration_bounds = array<i64: 1, 1>, scalar_prefetch = 0 : i64, scratch_operands = 1 : i64, tpu.core_type = #tpu.core_type<tc>, window_params = [{transform_indices = @transform_0, window_bounds = array<i64: 4, 64>}, {transform_indices = @transform_1, window_bounds = array<i64: 4, 64>}, {transform_indices = @transform_2, window_bounds = array<i64: 4, 64>}, {transform_indices = @transform_3, window_bounds = array<i64: 8, 128>}]} {
    %c0_i32 = arith.constant 0 : i32
    %0 = arith.cmpi eq, %arg1, %c0_i32 : i32
    %1 = arith.extui %0 : i1 to i32
    %c0_i32_0 = arith.constant 0 : i32
    %2 = arith.cmpi ne, %1, %c0_i32_0 : i32
    scf.if %2 {
      %cst_14 = arith.constant 0.000000e+00 : f32
      %23 = vector.broadcast %cst_14 : f32 to vector<4x64xf32>
      %c0_15 = arith.constant 0 : index
      %c0_16 = arith.constant 0 : index
      %24 = vector.load %arg6[%c0_15, %c0_16] : memref<4x64xf32, #tpu.memory_space<vmem>>, vector<4x64xf32>
      tpu.vector_store %arg6[%c0_15, %c0_16], %23 {strides = array<i32>} : memref<4x64xf32, #tpu.memory_space<vmem>>, vector<4x64xf32>,
    } else {
    }
    %c0 = arith.constant 0 : index
    %c0_1 = arith.constant 0 : index
    %3 = vector.load %arg2[%c0, %c0_1] : memref<4x64xf32, #tpu.memory_space<vmem>>, vector<4x64xf32>
    %c0_2 = arith.constant 0 : index
    %c0_3 = arith.constant 0 : index
    %4 = vector.load %arg3[%c0_2, %c0_3] : memref<4x64xf32, #tpu.memory_space<vmem>>, vector<4x64xf32>
    %c0_4 = arith.constant 0 : index
    %c0_5 = arith.constant 0 : index
    %5 = vector.load %arg4[%c0_4, %c0_5] : memref<4x64xf32, #tpu.memory_space<vmem>>, vector<4x64xf32>
    %6 = arith.divf %5, %4 : vector<4x64xf32>
    %7 = arith.cmpf one, %6, %6 : vector<4x64xf32>
    %cst = arith.constant 0.000000e+00 : f32
    %8 = vector.broadcast %cst : f32 to vector<4x64xf32>
    %9 = arith.select %7, %8, %6 : vector<4x64xi1>, vector<4x64xf32>
    %cst_6 = arith.constant 0x7F800000 : f32
    %10 = vector.broadcast %cst_6 : f32 to vector<4x64xf32>
    %11 = arith.cmpf oeq, %9, %10 : vector<4x64xf32>
    %cst_7 = arith.constant 0.000000e+00 : f32
    %12 = vector.broadcast %cst_7 : f32 to vector<4x64xf32>
    %13 = arith.select %11, %12, %9 : vector<4x64xi1>, vector<4x64xf32>
    %14 = arith.subf %3, %4 : vector<4x64xf32>
    %15 = arith.mulf %14, %13 : vector<4x64xf32>
    %16 = math.absf %15 : vector<4x64xf32>
    %c0_8 = arith.constant 0 : index
    %c0_9 = arith.constant 0 : index
    %17 = vector.load %arg6[%c0_8, %c0_9] : memref<4x64xf32, #tpu.memory_space<vmem>>, vector<4x64xf32>
    %18 = arith.addf %17, %16 : vector<4x64xf32>
    %c0_10 = arith.constant 0 : index
    %c0_11 = arith.constant 0 : index
    %19 = vector.load %arg6[%c0_10, %c0_11] : memref<4x64xf32, #tpu.memory_space<vmem>>, vector<4x64xf32>
    tpu.vector_store %arg6[%c0_10, %c0_11], %18 {strides = array<i32>} : memref<4x64xf32, #tpu.memory_space<vmem>>, vector<4x64xf32>,
    %c0_i32_12 = arith.constant 0 : i32
    %20 = arith.cmpi eq, %arg1, %c0_i32_12 : i32
    %21 = arith.extui %20 : i1 to i32
    %c0_i32_13 = arith.constant 0 : i32
    %22 = arith.cmpi ne, %21, %c0_i32_13 : i32
    scf.if %22 {
      %c0_14 = arith.constant 0 : index
      %c0_15 = arith.constant 0 : index
      %23 = vector.load %arg6[%c0_14, %c0_15] : memref<4x64xf32, #tpu.memory_space<vmem>>, vector<4x64xf32>
      %24 = vector.shape_cast %23 : vector<4x64xf32> to vector<1x4x64xf32>
      %cst_16 = arith.constant dense<0.000000e+00> : vector<1xf32>
      %25 = vector.multi_reduction <add>, %24, %cst_16 [1, 2] : vector<1x4x64xf32> to vector<1xf32>
      %26 = vector.shape_cast %25 : vector<1xf32> to vector<1x1x1xf32>
      %27 = vector.extract %26[0, 0, 0] : f32 from vector<1x1x1xf32>
      %28 = tpu.iota {dimensions = array<i32: 0>} : vector<8x128xi32>
      %29 = tpu.iota {dimensions = array<i32: 1>} : vector<8x128xi32>
      %c0_i32_17 = arith.constant 0 : i32
      %30 = vector.broadcast %c0_i32_17 : i32 to vector<8x128xi32>
      %31 = arith.cmpi eq, %28, %30 : vector<8x128xi32>
      %c0_i32_18 = arith.constant 0 : i32
      %32 = vector.broadcast %c0_i32_18 : i32 to vector<8x128xi32>
      %33 = arith.cmpi eq, %29, %32 : vector<8x128xi32>
      %34 = arith.andi %31, %33 : vector<8x128xi1>
      %cst_19 = arith.constant 0.000000e+00 : f32
      %35 = vector.broadcast %27 : f32 to vector<8x128xf32>
      %36 = vector.broadcast %cst_19 : f32 to vector<8x128xf32>
      %37 = arith.select %34, %35, %36 : vector<8x128xi1>, vector<8x128xf32>
      %c0_20 = arith.constant 0 : index
      %c0_21 = arith.constant 0 : index
      %38 = vector.load %arg5[%c0_20, %c0_21] : memref<8x128xf32, #tpu.memory_space<vmem>>, vector<8x128xf32>
      tpu.vector_store %arg5[%c0_20, %c0_21], %37 {strides = array<i32>} : memref<8x128xf32, #tpu.memory_space<vmem>>, vector<8x128xf32>,
    } else {
    }
    return
  }
  func.func @transform_0(%arg0: i32, %arg1: i32) -> (i32, i32) {
    %c0_i32 = arith.constant 0 : i32
    return %arg0, %arg1 : i32, i32
  }
  func.func @transform_1(%arg0: i32, %arg1: i32) -> (i32, i32) {
    %c0_i32 = arith.constant 0 : i32
    return %arg0, %arg1 : i32, i32
  }
  func.func @transform_2(%arg0: i32, %arg1: i32) -> (i32, i32) {
    %c0_i32 = arith.constant 0 : i32
    return %arg0, %arg1 : i32, i32
  }
  func.func @transform_3(%arg0: i32, %arg1: i32) -> (i32, i32) {
    %c0_i32 = arith.constant 0 : i32
    %c0_i32_0 = arith.constant 0 : i32
    return %arg0, %c0_i32 : i32, i32
  }
}

</mosaic_0001>

<bundles_post_ra>
// kernel: tpu_custom_call.1
= control target key start
LH: loop header
LB: loop body
LE: loop exit
PB: predicated region body
PF: predicated region fallthrough
CT: control target
= control target key end

     0   :  { %8 = vsyncpa [#allocation4], 0  ;;  %s247_s0 = inlined_call_operand.hbm [shape: f32[4,64], index: 0, kind: input, shape index: {}]   ;;  %s248_s1 = inlined_call_operand.hbm [shape: f32[4,64], index: 1, kind: input, shape index: {}]   ;;  %s249_s2 = inlined_call_operand.hbm [shape: f32[4,64], index: 2, kind: input, shape index: {}]   ;;  %s250_s3 = inlined_call_operand.hbm [shape: f32[8,128], index: 3, kind: output, shape index: {}]  }
   0x1   :  { %9 = vsyncpa [#allocation7], 0 }
   0x2   :  { %10 = vsyncpa [#allocation5], 0  ;;  %s207_s12 = smov [#allocation6]   ;;  %s208_s14 = smov [#allocation3]  }
   0x3   :  { %s27_s13 = sshll.u32 %s207_s12, 4  ;;  %s17_s15 = sshll.u32 %s208_s14, 4  ;;  %s28_s13 = int_to_ptr.vmem [resolvable:$true] %s27_s13  ;;  %s18_s15 = int_to_ptr.vmem [resolvable:$true] %s17_s15 }
   0x4   :  { %s129_s16 = scalar_lea.vmem %s28_s13, 64  ;;  %p134_p1 = scmp.lt.s32.totalorder %s28_s13, %s28_s13 }
   0x5   :  { %p130_p0 = scmp.ne.s32.totalorder %s28_s13, %s129_s16  ;;  %p135_p2 = scmp.lt.s32.totalorder %s129_s16, %s129_s16 }
   0x7   :  { %p136_p3 = por %p135_p2, %p134_p1 }
   0x9   :  { %p137_p4 = pnand %p136_p3, %p130_p0 }
   0xb   :  { %140 = shalt.err (!%p137_p4)
}
   0xc   :  { %30 = dma.hbm_to_vmem [thread:$0]  %s248_s1, 64, %s28_s13, [#allocation7]  }
   0xd   :  { %s149_s19 = scalar_lea.vmem %s18_s15, 64  ;;  %p154_p6 = scmp.lt.s32.totalorder %s18_s15, %s18_s15 }
   0xe   :  { %p150_p5 = scmp.ne.s32.totalorder %s18_s15, %s149_s19  ;;  %p155_p7 = scmp.lt.s32.totalorder %s149_s19, %s149_s19 }
  0x10   :  { %p156_p8 = por %p155_p7, %p154_p6 }
  0x12   :  { %p157_p9 = pnand %p156_p8, %p150_p5 }
  0x14   :  { %160 = shalt.err (!%p157_p9)
}
  0x15   :  { %20 = dma.hbm_to_vmem [thread:$0]  %s247_s0, 64, %s18_s15, [#allocation4]  }
  0x16   :  { %s209_s22 = smov [#allocation8]  }
  0x17   :  { %s37_s23 = sshll.u32 %s209_s22, 4  ;;  %s38_s23 = int_to_ptr.vmem [resolvable:$true] %s37_s23 }
  0x18   :  { %s169_s24 = scalar_lea.vmem %s38_s23, 64  ;;  %p174_p11 = scmp.lt.s32.totalorder %s38_s23, %s38_s23 }
  0x19   :  { %p170_p10 = scmp.ne.s32.totalorder %s38_s23, %s169_s24  ;;  %p175_p12 = scmp.lt.s32.totalorder %s169_s24, %s169_s24 }
  0x1b   :  { %p176_p13 = por %p175_p12, %p174_p11 }
  0x1d   :  { %p177_p0 = pnand %p176_p13, %p170_p10 }
  0x1f   :  { %180 = shalt.err (!%p177_p0)
}
  0x20   :  { %40 = dma.hbm_to_vmem [thread:$0]  %s249_s2, 64, %s38_s23, [#allocation7]  }
  0x21   :  { %201 = dma.done.wait [#allocation4], 64  }
  0x22   :  { %202 = vsyncadd [#allocation4], 4294967232 }
  0x23   :  { %203 = dma.done.wait [#allocation7], 128  }
  0x24   :  { %204 = vsyncadd [#allocation7], 4294967168  ;;  %vm54_vm0 = vcmask 519168   ;;  %v210_v0 = vmov 0.0   ;;  %v57_v1 = vld [vmem:[#allocation6] sm:$0xf]  ;;  %v86_v22 = vlaneseq }
  0x25   :  { %55 = vst.msk [vmem:[#allocation2] sm:$0xf] %vm54_vm0, %v210_v0  ;;  %119 = vrcp.f32 %v57_v1  ;;  %v58_v2 = vld [vmem:[#allocation8] sm:$0xf]  ;;  %v56_v4 = vld [vmem:[#allocation3] sm:$0xf] }
  0x26   :  { %v65_v6 = vsub.f32 %v56_v4, %v57_v1  ;;  %v87_v23 = vshrl.u32 %v86_v22, 7  ;;  %v89_v24 = vand.u32 127, %v86_v22  ;;  %s211_s0 = smov [#allocation9]  }
  0x27   :  { %s102_s2 = sshll.u32 %s211_s0, 4  ;;  %s103_s2 = int_to_ptr.vmem [resolvable:$true] %s102_s2 }
  0x28   :  { %vm90_vm3 = vcmp.eq.s32.totalorder %v87_v23, 0  ;;  %vm91_vm4 = vcmp.eq.s32.totalorder %v89_v24, 0  ;;  %s181_s27 = scalar_lea.vmem %s103_s2, 128  ;;  %p186_p2 = scmp.lt.s32.totalorder %s103_s2, %s103_s2 }
  0x29   :  { %vm92_vm5 = vmand %vm90_vm3, %vm91_vm4  ;;  %p182_p1 = scmp.ne.s32.totalorder %s103_s2, %s181_s27  ;;  %p187_p3 = scmp.lt.s32.totalorder %s181_s27, %s181_s27 }
  0x2b   :  { %p188_p4 = por %p187_p3, %p186_p2 }
  0x2c   :  { %v68_v10 = vld [vmem:[#allocation2] sm:$0xf] }
  0x2d   :  { %p189_p5 = pnand %p188_p4, %p182_p1 }
  0x32   :  { %v120_v3 = vpop.eup %119 }
  0x33   :  { %v60_v5 = vmul.f32 %v120_v3, %v58_v2 }
  0x35   :  { %vm61_vm1 = vcmp.ne.f32.partialorder %v60_v5, %v60_v5 }
  0x36   :  { %v62_v7 = vsel %vm61_vm1, 0.0, %v60_v5 }
  0x37   :  { %vm63_vm2 = vcmp.eq.f32.partialorder %v62_v7, inf }
  0x38   :  { %v64_v8 = vsel %vm63_vm2, 0.0, %v62_v7 }
  0x39   :  { %v66_v9 = vmul.f32 %v65_v6, %v64_v8 }
  0x3b   :  { %v67_v11 = vand.u32 2147483647, %v66_v9 }
  0x3d   :  { %v69_v12 = vadd.f32 %v68_v10, %v67_v11 }
  0x3f   :  { %71 = vst.msk [vmem:[#allocation2] sm:$0xf] %vm54_vm0, %v69_v12 }
  0x46   :  { %v75_v13 = vld [vmem:[#allocation2] sm:$0xf] }
  0x47   :  { %v76_v14 = vsel %vm54_vm0, %v75_v13, 0.0 }
  0x48   :  { %77 = vadd.xlane.f32.xlu0 %v76_v14 }
  0xd1   :  { %v78_v15 = vpop.xlane.xlu0 %77 }
  0xd2   :  { %v79_v16 = vrot.slane %v78_v15, 4 }
  0xd4   :  { %v80_v17 = vadd.f32 %v79_v16, %v78_v15 }
  0xd6   :  { %v81_v18 = vrot.slane %v80_v17, 2 }
  0xd8   :  { %v82_v19 = vadd.f32 %v81_v18, %v80_v17 }
  0xda   :  { %v83_v20 = vrot.slane %v82_v19, 1 }
  0xdc   :  { %v84_v21 = vadd.f32 %v83_v20, %v82_v19 }
  0xde   :  { %112 = vpush %v84_v21 }
 0x10f   :  { %s113_s26 = spop %112 }
 0x110   :  { %v93_v25 = vstv %s113_s26 }
 0x111   :  { %v94_v26 = vsel %vm92_vm5, %v93_v25, 0.0 }
 0x112   :  { %95 = vst [vmem:[#allocation9] sm:$0xff] %v94_v26 }
 0x113   :  { %192 = shalt.err (!%p189_p5)
}
 0x114   :  { %105 = dma.vmem_to_hbm [thread:$0]  %s103_s2, 128, %s250_s3, [#allocation5]  }
 0x115   :  { %205 = dma.done.wait [#allocation5], 128  }
 0x116   :  { %206 = vsyncadd [#allocation5], 4294967168 }
 0x117   :  { %109 = vsyncpa [#allocation4], 1 }
 0x118   :  { %110 = vsyncpa [#allocation7], 1 }
 0x119   :  { %111 = vsyncpa [#allocation5], 1 }

</bundles_post_ra>
